<compile_context>
chip_gen: v5e
topology: v5e:2x2
jax: 0.10.0
libtpu: 0.0.40
codegen_flags: <defaults>
</compile_context>

<pallas_src>
import jax
import jax.numpy as jnp
import numpy as np
from jax.experimental import pallas as pl
from jax.experimental.pallas import tpu as pltpu


_MAX_TB = 4096   # rows per grid step; multiple of 8; a few MB of VMEM at MLP widths


def _round_up(x, m):
    return ((x + m - 1) // m) * m


def _tensorcores_per_chip():
    """Best-effort TensorCore count per chip (v7x has 2, v5e/v6e have 1)."""
    try:
        kind = jax.devices()[0].device_kind.lower()
    except Exception:
        return 1
    return 2 if "v7" in kind else 1


def _pick_batch_tile(B, n_cores):
    """Pick the batch tile: as large as possible (amortize the ~0.35us/grid-step
    pipeline overhead), but yielding >= n_cores grid steps on multi-TC chips so
    the 'parallel' batch axis actually shards across both TensorCores."""
    if n_cores > 1 and B >= 16:
        tb = min(_MAX_TB, -(-B // n_cores))      # cdiv(B, n_cores)
    else:
        tb = min(B, _MAX_TB)
    if tb != B and tb % 8 != 0:                  # block dim must be 8-multiple unless full extent
        tb = _round_up(tb, 8)
    return max(tb, 1)


# ----------------------------------------------------------------------------
# Fused kernel builder: runs the entire [fc -> relu]* -> head chain in VMEM.
# ----------------------------------------------------------------------------
def _make_fused_kernel(layer_specs, uses_action_any, compute_dtype):
    """layer_specs: tuple of (uses_action: bool, relu: bool) per linear layer."""

    def kernel(*refs):
        out_ref = refs[-1]
        idx = 0
        # Activations are carried in f32 between layers; the cast to the MXU
        # compute dtype happens right at each matmul input (same rounding as
        # casting earlier, simplest lane layout for the in-kernel concat).
        h = refs[idx][...].astype(jnp.float32)
        idx += 1
        a = None
        if uses_action_any:
            a = refs[idx][...].astype(jnp.float32)
            idx += 1

        acc = None
        for uses_action, relu in layer_specs:
            w = refs[idx][...]              # (Din[+A], Dout) in compute_dtype
            idx += 1
            b = refs[idx][...]              # (1, Dout) f32, broadcasts over rows
            idx += 1
            # Merged action injection: one lane-axis concat (XLU, plenty of
            # slack) + a single MXU push instead of two split matmuls.
            inp = jnp.concatenate([h, a], axis=-1) if uses_action else h
            acc = jnp.dot(inp.astype(compute_dtype), w,
                          preferred_element_type=jnp.float32) + b
            if relu:
                acc = jnp.maximum(acc, 0.0)
            h = acc

        out_ref[...] = acc                  # single f32 writeback

    return kernel


# ----------------------------------------------------------------------------
# Parameter init (PyTorch nn.Linear default: U(-1/sqrt(fan_in), 1/sqrt(fan_in)))
# with the state/hidden part and the action part merged into ONE weight.
# Rows [0:fan_in_main] multiply x / hidden, rows [fan_in_main:] multiply the
# action, i.e. exactly torch.cat((x, a), dim=1) @ W.T .
# ----------------------------------------------------------------------------
def _init_linear_merged(key, fan_in_main, fan_in_action, fan_out, bias, compute_dtype):
    fan_in = fan_in_main + fan_in_action
    kw, kb = jax.random.split(key)
    bound = float(fan_in) ** -0.5
    w = jax.random.uniform(kw, (fan_in, fan_out), jnp.float32, -bound, bound)
    if bias:
        b = jax.random.uniform(kb, (fan_out,), jnp.float32, -bound, bound)
    else:
        b = jnp.zeros((fan_out,), jnp.float32)
    return {"w": w.astype(compute_dtype), "b": b.reshape(1, fan_out)}


# ----------------------------------------------------------------------------
# StateActionVFNN: whole forward pass runs inside one Pallas kernel.
# ----------------------------------------------------------------------------
class StateActionVFNN:
    def __init__(self, key, state_shape, num_actions, layers_type, layers_features,
                 action_layer_num, compute_dtype=jnp.bfloat16):
        self.layers_type = list(layers_type)
        self.action_layer_num = action_layer_num
        self.num_actions = num_actions
        self.compute_dtype = compute_dtype

        n_hidden = len(layers_type)
        self._n_hidden = n_hidden
        keys = jax.random.split(key, n_hidden + 1)

        self._layer_params = []   # list of {"w": (Din[+A], Dout), "b": (1, Dout)}
        self._layer_specs = []    # list of (uses_action, relu)
        self._layer_dims = []     # list of (fan_in_total, fan_out) for cost estimate

        prev = state_shape[1]
        for i, layer in enumerate(layers_type):
            if layer == "conv":
                raise NotImplementedError("convolutional layer is not implemented")
            elif layer == "fc":
                # The original source injects the action at 0-based hidden-layer
                # index  i == action_layer_num  (and at the head when
                # action_layer_num == len(layers_type)).  Same convention here.
                uses_action = (i == self.action_layer_num)
                fan_in_action = num_actions if uses_action else 0
                self._layer_params.append(_init_linear_merged(
                    keys[i], prev, fan_in_action, layers_features[i], True, compute_dtype))
                self._layer_specs.append((uses_action, True))
                self._layer_dims.append((prev + fan_in_action, layers_features[i]))
                prev = layers_features[i]
            else:
                raise ValueError("layer is not defined")

        # head
        if n_hidden > 0:
            if self.action_layer_num == n_hidden:
                self._layer_params.append(_init_linear_merged(
                    keys[-1], prev, num_actions, 1, True, compute_dtype))
                self._layer_specs.append((True, False))
                self._layer_dims.append((prev + num_actions, 1))
            elif self.action_layer_num == n_hidden + 1:
                self._layer_params.append(_init_linear_merged(
                    keys[-1], prev, 0, num_actions, True, compute_dtype))
                self._layer_specs.append((False, False))
                self._layer_dims.append((prev, num_actions))
            else:
                self._layer_params.append(_init_linear_merged(
                    keys[-1], prev, 0, 1, True, compute_dtype))
                self._layer_specs.append((False, False))
                self._layer_dims.append((prev, 1))
        elif self.action_layer_num == n_hidden:          # no hidden layers, action in head
            self._layer_params.append(_init_linear_merged(
                keys[-1], state_shape[1], num_actions, 1, False, compute_dtype))
            self._layer_specs.append((True, False))
            self._layer_dims.append((state_shape[1] + num_actions, 1))
        elif self.action_layer_num == n_hidden + 1:      # no hidden layers, no action
            self._layer_params.append(_init_linear_merged(
                keys[-1], state_shape[1], 0, num_actions, False, compute_dtype))
            self._layer_specs.append((False, False))
            self._layer_dims.append((state_shape[1], num_actions))
        # else: the original module defines no head either (its forward would fail too)

        self._uses_action_any = any(s[0] for s in self._layer_specs)
        self._out_dim = self._layer_params[-1]["b"].shape[1]

        # Flat kernel-argument order: (w, b) per layer. Built/cast once.
        self._flat_params = []
        for p in self._layer_params:
            self._flat_params.append(p["w"])
            self._flat_params.append(p["b"])
        self._param_bytes = int(sum(int(np.prod(q.shape)) * q.dtype.itemsize
                                    for q in self._flat_params))
        self._widest = max([fo for _, fo in self._layer_dims]
                           + [fi for fi, _ in self._layer_dims])
        self._flops_per_row = 2 * sum(fi * fo for fi, fo in self._layer_dims)

        self._kernel = _make_fused_kernel(tuple(self._layer_specs),
                                          self._uses_action_any, compute_dtype)

    def __call__(self, state, action=None):
        if self.action_layer_num != self._n_hidden + 1 and action is None:
            raise ValueError("action is not given")

        # flatten(start_dim=1); deliberately NO wrapper-side dtype cast (a
        # standalone cast would add its own HBM round trip).
        x = state.reshape(state.shape[0], -1)
        B, Dx = x.shape

        inputs = [x]
        Da = 0
        if self._uses_action_any:
            a = action.reshape(action.shape[0], -1)
            Da = a.shape[1]
            inputs.append(a)
        inputs.extend(self._flat_params)

        n_cores = _tensorcores_per_chip()
        TB = _pick_batch_tile(B, n_cores)
        grid = (pl.cdiv(B, TB),)

        in_specs = [pl.BlockSpec((TB, Dx), lambda i: (i, 0))]
        if self._uses_action_any:
            in_specs.append(pl.BlockSpec((TB, Da), lambda i: (i, 0)))

        # Grid-invariant parameters: single-buffer them once they are big
        # enough for double-buffering to matter for VMEM (wide layers_features).
        single_buffer_params = self._param_bytes > (2 << 20)
        param_kwargs = {"pipeline_mode": pl.Buffered(1)} if single_buffer_params else {}
        for p in self._flat_params:
            in_specs.append(pl.BlockSpec(p.shape, lambda i: (0, 0), **param_kwargs))

        out_specs = pl.BlockSpec((TB, self._out_dim), lambda i: (i, 0))

        # Explicit scoped-VMEM limit only when the default (16/32 MiB) could be
        # tight: double-buffered streaming blocks + params + f32 intermediates.
        act_itemsize = int(inputs[1].dtype.itemsize) if self._uses_action_any else 0
        est = (2 * TB * Dx * int(x.dtype.itemsize)
               + 2 * TB * Da * act_itemsize
               + 2 * TB * self._out_dim * 4
               + (1 if single_buffer_params else 2) * self._param_bytes
               + 3 * TB * self._widest * 4)
        vmem_limit = None
        if est > (12 << 20):
            vmem_limit = min(int(est * 1.5) + (2 << 20), 64 << 20)

        cost = pl.CostEstimate(
            flops=int(self._flops_per_row) * int(B),
            transcendentals=0,
            bytes_accessed=int(B * Dx * int(x.dtype.itemsize)
                               + B * Da * act_itemsize
                               + self._param_bytes
                               + B * self._out_dim * 4),
        )

        return pl.pallas_call(
            self._kernel,
            out_shape=jax.ShapeDtypeStruct((B, self._out_dim), jnp.float32),
            grid=grid,
            in_specs=in_specs,
            out_specs=out_specs,
            compiler_params=pltpu.CompilerParams(
                dimension_semantics=("parallel",),
                vmem_limit_bytes=vmem_limit),
            cost_estimate=cost,
        )(*inputs)


# ----------------------------------------------------------------------------
# Pure-JAX reference (same compute-dtype parameter/activation rounding,
# true-f32 matmuls).
# ----------------------------------------------------------------------------
def reference_forward(model, state, action=None):
    cd = model.compute_dtype
    h = state.reshape(state.shape[0], -1).astype(jnp.float32)
    a = None
    if model._uses_action_any:
        a = action.reshape(action.shape[0], -1).astype(jnp.float32)
    acc = None
    for p, (uses_action, relu) in zip(model._layer_params, model._layer_specs):
        inp = jnp.concatenate([h, a], axis=-1) if uses_action else h
        acc = jnp.dot(inp.astype(cd).astype(jnp.float32),
                      p["w"].astype(jnp.float32),
                      precision=jax.lax.Precision.HIGHEST) + p["b"]
        if relu:
            acc = jnp.maximum(acc, 0.0)
        h = acc
    return acc


# ----------------------------------------------------------------------------
if __name__ == "__main__":
    key = jax.random.PRNGKey(0)
    k_params, k_state, k_action = jax.random.split(key, 3)

    batch = 2
    state_dim = 16
    num_actions = 4
    layers_type = ["fc", "fc"]
    layers_features = [32, 32]
    action_layer_num = 1   # action injected at 0-based hidden-layer index 1 (as in the source)

    model = StateActionVFNN(k_params,
                            state_shape=(batch, state_dim),
                            num_actions=num_actions,
                            layers_type=layers_type,
                            layers_features=layers_features,
                            action_layer_num=action_layer_num)

    state = jax.random.normal(k_state, (batch, state_dim), jnp.float32)
    act_idx = jax.random.randint(k_action, (batch,), 0, num_actions)
    action = jax.nn.one_hot(act_idx, num_actions, dtype=jnp.float32)

    out = jax.block_until_ready(model(state, action))
    assert out.shape == (batch, 1), out.shape

    ref = jax.block_until_ready(reference_forward(model, state, action))
    np.testing.assert_allclose(np.asarray(out), np.asarray(ref), rtol=1e-3, atol=1e-3)

    print("KERNEL_OK")
</pallas_src>

<mosaic_0001>
module attributes {stable_mosaic.version = 11 : i64} {
  func.func @kernel(%arg0: i32, %arg1: memref<2x16xf32, #tpu.memory_space<vmem>>, %arg2: memref<2x4xf32, #tpu.memory_space<vmem>>, %arg3: memref<16x32xbf16, #tpu.memory_space<vmem>>, %arg4: memref<1x32xf32, #tpu.memory_space<vmem>>, %arg5: memref<36x32xbf16, #tpu.memory_space<vmem>>, %arg6: memref<1x32xf32, #tpu.memory_space<vmem>>, %arg7: memref<32x1xbf16, #tpu.memory_space<vmem>>, %arg8: memref<1x1xf32, #tpu.memory_space<vmem>>, %arg9: memref<2x1xf32, #tpu.memory_space<vmem>>) attributes {dimension_semantics = [#tpu.dimension_semantics<parallel>], iteration_bounds = array<i64: 1>, scalar_prefetch = 0 : i64, scratch_operands = 0 : i64, tpu.core_type = #tpu.core_type<tc>, window_params = [{transform_indices = @transform_0, window_bounds = array<i64: 2, 16>}, {transform_indices = @transform_1, window_bounds = array<i64: 2, 4>}, {pipeline_mode = #tpu.pipeline_mode<synchronous>, transform_indices = @transform_2, window_bounds = array<i64: 16, 32>}, {pipeline_mode = #tpu.pipeline_mode<synchronous>, transform_indices = @transform_3, window_bounds = array<i64: 1, 32>}, {pipeline_mode = #tpu.pipeline_mode<synchronous>, transform_indices = @transform_4, window_bounds = array<i64: 36, 32>}, {pipeline_mode = #tpu.pipeline_mode<synchronous>, transform_indices = @transform_5, window_bounds = array<i64: 1, 32>}, {pipeline_mode = #tpu.pipeline_mode<synchronous>, transform_indices = @transform_6, window_bounds = array<i64: 32, 1>}, {pipeline_mode = #tpu.pipeline_mode<synchronous>, transform_indices = @transform_7, window_bounds = array<i64: 1, 1>}, {transform_indices = @transform_8, window_bounds = array<i64: 2, 1>}]} {
    %c0 = arith.constant 0 : index
    %c0_0 = arith.constant 0 : index
    %0 = vector.load %arg1[%c0, %c0_0] : memref<2x16xf32, #tpu.memory_space<vmem>>, vector<2x16xf32>
    %c0_1 = arith.constant 0 : index
    %c0_2 = arith.constant 0 : index
    %1 = vector.load %arg2[%c0_1, %c0_2] : memref<2x4xf32, #tpu.memory_space<vmem>>, vector<2x4xf32>
    %c0_3 = arith.constant 0 : index
    %c0_4 = arith.constant 0 : index
    %2 = vector.load %arg3[%c0_3, %c0_4] : memref<16x32xbf16, #tpu.memory_space<vmem>>, vector<16x32xbf16>
    %c0_5 = arith.constant 0 : index
    %c0_6 = arith.constant 0 : index
    %3 = vector.load %arg4[%c0_5, %c0_6] : memref<1x32xf32, #tpu.memory_space<vmem>>, vector<1x32xf32>
    %4 = arith.truncf %0 : vector<2x16xf32> to vector<2x16xbf16>
    %cst = arith.constant dense<0.000000e+00> : vector<2x32xf32>
    %5 = tpu.matmul %4, %2, %cst {dimension_numbers = #tpu.dot_dimension_numbers<[1], [0], [0], [1], [0, 0, 1, 1], [], []>} : vector<2x16xbf16>, vector<16x32xbf16>, vector<2x32xf32> -> vector<2x32xf32>
    %6 = vector.broadcast %3 : vector<1x32xf32> to vector<2x32xf32>
    %7 = arith.addf %5, %6 : vector<2x32xf32>
    %cst_7 = arith.constant 0.000000e+00 : f32
    %8 = vector.broadcast %cst_7 : f32 to vector<2x32xf32>
    %9 = arith.maximumf %7, %8 : vector<2x32xf32>
    %c0_8 = arith.constant 0 : index
    %c0_9 = arith.constant 0 : index
    %10 = vector.load %arg5[%c0_8, %c0_9] : memref<36x32xbf16, #tpu.memory_space<vmem>>, vector<36x32xbf16>
    %c0_10 = arith.constant 0 : index
    %c0_11 = arith.constant 0 : index
    %11 = vector.load %arg6[%c0_10, %c0_11] : memref<1x32xf32, #tpu.memory_space<vmem>>, vector<1x32xf32>
    %12 = tpu.concatenate %9, %1 in 1 : vector<2x32xf32>, vector<2x4xf32> -> vector<2x36xf32>
    %13 = arith.truncf %12 : vector<2x36xf32> to vector<2x36xbf16>
    %cst_12 = arith.constant dense<0.000000e+00> : vector<2x32xf32>
    %14 = tpu.matmul %13, %10, %cst_12 {dimension_numbers = #tpu.dot_dimension_numbers<[1], [0], [0], [1], [0, 0, 1, 1], [], []>} : vector<2x36xbf16>, vector<36x32xbf16>, vector<2x32xf32> -> vector<2x32xf32>
    %15 = vector.broadcast %11 : vector<1x32xf32> to vector<2x32xf32>
    %16 = arith.addf %14, %15 : vector<2x32xf32>
    %cst_13 = arith.constant 0.000000e+00 : f32
    %17 = vector.broadcast %cst_13 : f32 to vector<2x32xf32>
    %18 = arith.maximumf %16, %17 : vector<2x32xf32>
    %c0_14 = arith.constant 0 : index
    %c0_15 = arith.constant 0 : index
    %19 = vector.load %arg7[%c0_14, %c0_15] : memref<32x1xbf16, #tpu.memory_space<vmem>>, vector<32x1xbf16>
    %c0_16 = arith.constant 0 : index
    %c0_17 = arith.constant 0 : index
    %20 = vector.load %arg8[%c0_16, %c0_17] : memref<1x1xf32, #tpu.memory_space<vmem>>, vector<1x1xf32>
    %21 = arith.truncf %18 : vector<2x32xf32> to vector<2x32xbf16>
    %cst_18 = arith.constant dense<0.000000e+00> : vector<2x1xf32>
    %22 = tpu.matmul %21, %19, %cst_18 {dimension_numbers = #tpu.dot_dimension_numbers<[1], [0], [0], [1], [0, 0, 1, 1], [], []>} : vector<2x32xbf16>, vector<32x1xbf16>, vector<2x1xf32> -> vector<2x1xf32>
    %23 = vector.broadcast %20 : vector<1x1xf32> to vector<2x1xf32>
    %24 = arith.addf %22, %23 : vector<2x1xf32>
    %c0_19 = arith.constant 0 : index
    %c0_20 = arith.constant 0 : index
    %25 = vector.load %arg9[%c0_19, %c0_20] : memref<2x1xf32, #tpu.memory_space<vmem>>, vector<2x1xf32>
    tpu.vector_store %arg9[%c0_19, %c0_20], %24 {strides = array<i32>} : memref<2x1xf32, #tpu.memory_space<vmem>>, vector<2x1xf32>,
    return
  }
  func.func @transform_0(%arg0: i32) -> (i32, i32) {
    %c0_i32 = arith.constant 0 : i32
    %c0_i32_0 = arith.constant 0 : i32
    return %arg0, %c0_i32 : i32, i32
  }
  func.func @transform_1(%arg0: i32) -> (i32, i32) {
    %c0_i32 = arith.constant 0 : i32
    %c0_i32_0 = arith.constant 0 : i32
    return %arg0, %c0_i32 : i32, i32
  }
  func.func @transform_2(%arg0: i32) -> (i32, i32) {
    %c0_i32 = arith.constant 0 : i32
    %c0_i32_0 = arith.constant 0 : i32
    %c0_i32_1 = arith.constant 0 : i32
    return %c0_i32, %c0_i32_0 : i32, i32
  }
  func.func @transform_3(%arg0: i32) -> (i32, i32) {
    %c0_i32 = arith.constant 0 : i32
    %c0_i32_0 = arith.constant 0 : i32
    %c0_i32_1 = arith.constant 0 : i32
    return %c0_i32, %c0_i32_0 : i32, i32
  }
  func.func @transform_4(%arg0: i32) -> (i32, i32) {
    %c0_i32 = arith.constant 0 : i32
    %c0_i32_0 = arith.constant 0 : i32
    %c0_i32_1 = arith.constant 0 : i32
    return %c0_i32, %c0_i32_0 : i32, i32
  }
  func.func @transform_5(%arg0: i32) -> (i32, i32) {
    %c0_i32 = arith.constant 0 : i32
    %c0_i32_0 = arith.constant 0 : i32
    %c0_i32_1 = arith.constant 0 : i32
    return %c0_i32, %c0_i32_0 : i32, i32
  }
  func.func @transform_6(%arg0: i32) -> (i32, i32) {
    %c0_i32 = arith.constant 0 : i32
    %c0_i32_0 = arith.constant 0 : i32
    %c0_i32_1 = arith.constant 0 : i32
    return %c0_i32, %c0_i32_0 : i32, i32
  }
  func.func @transform_7(%arg0: i32) -> (i32, i32) {
    %c0_i32 = arith.constant 0 : i32
    %c0_i32_0 = arith.constant 0 : i32
    %c0_i32_1 = arith.constant 0 : i32
    return %c0_i32, %c0_i32_0 : i32, i32
  }
  func.func @transform_8(%arg0: i32) -> (i32, i32) {
    %c0_i32 = arith.constant 0 : i32
    %c0_i32_0 = arith.constant 0 : i32
    return %arg0, %c0_i32 : i32, i32
  }
}

</mosaic_0001>

<bundles_post_ra>
// kernel: tpu_custom_call.1
= control target key start
LH: loop header
LB: loop body
LE: loop exit
PB: predicated region body
PF: predicated region fallthrough
CT: control target
= control target key end

     0   :  { %s193_s11 = smov 32   ;;  %vm47_vm0 = vcmask 130048   ;;  %vm100_vm1 = vcmask 1041408   ;;  %vm75_vm2 = vcmask 261120   ;;  %vm96_vm3 = vcmask 293888   ;;  %s277_s2 = inlined_call_operand.vmem [shape: bf16[16,32], index: 2, kind: input, shape index: {}]   ;;  %s278_s0 = inlined_call_operand.vmem [shape: f32[2,16], index: 0, kind: input, shape index: {}]   ;;  %s279_s1 = inlined_call_operand.vmem [shape: f32[2,4], index: 1, kind: input, shape index: {}]   ;;  %s280_s4 = inlined_call_operand.vmem [shape: bf16[36,32], index: 4, kind: input, shape index: {}]   ;;  %s281_s3 = inlined_call_operand.vmem [shape: f32[1,32], index: 3, kind: input, shape index: {}]   ;;  %s282_s5 = inlined_call_operand.vmem [shape: f32[1,32], index: 5, kind: input, shape index: {}]   ;;  %s283_s6 = inlined_call_operand.vmem [shape: bf16[32,1], index: 6, kind: input, shape index: {}]   ;;  %s284_s7 = inlined_call_operand.<no memory space> [shape: f32[1,1], index: 7, kind: input, shape index: {}]   ;;  %s285_s8 = inlined_call_operand.vmem [shape: f32[2,1], index: 8, kind: output, shape index: {}]  }
   0x1   :  { %v184_v0 = vld [vmem:[%s277_s2] sm:$0xff]  ;;  %v69_v4 = vld [vmem:[%s280_s4 + $0x10] sm:$0x3]  ;;  %v186_v8 = vld [vmem:[%s280_s4 + $0x8] sm:$0xff]  ;;  %v13_v20 = vstv %s284_s7  ;;  %vm155_vm4 = vcmask 1024  }
   0x2   :  { %v32_v1 = vld [vmem:[%s278_s0] sm:$0x3]  ;;  %58 = vmatpush.bf16.msra.mxu0 %v184_v0  ;;  %v90_v5 = vunpack.c.l.b16 %v69_v4  ;;  %v188_v18 = vld [vmem:[%s283_s6 + $0x8] sm:$0xff]  ;;  %14 = vst [vmem:[#allocation2] sm:$0x1] %v13_v20 }
   0x3   :  { %v33_v2 = vld [vmem:[%s279_s1] sm:$0x3]  ;;  %v37_v3 = vpack.c.bf16 %v32_v1, %v32_v1  ;;  %148 = vmatpush.bf16.msra.mxu2 %v188_v18 }
   0x4   :  { %72 = vrot.lane.b32.xlu0 %v33_v2, %s193_s11  ;;  %v93_v6 = vpack.c.b16 %v90_v5, %v90_v5  ;;  %v185_v9 = vld [vmem:[%s280_s4] sm:$0xff] }
   0x5   :  { %165 = vmatmul.msk.bf16.vlgmr.msra.gmra.mxu0 %vm47_vm0, %v37_v3  ;;  %v190_v10 = vld [vmem:[%s281_s3] ss:$0 sm:$0xff] }
   0x6   :  { %v102_v7 = vsel %vm100_vm1, %v93_v6, 0  ;;  %v187_v19 = vld [vmem:[%s283_s6] sm:$0xff] }
   0x7   :  { %109 = vmatpush.bf16.msra.mxu1 %v102_v7  ;;  %149 = vmatpush.bf16.msra.mxu2 %v187_v19  ;;  %v191_v21 = vld [vmem:[%s282_s5] ss:$0 sm:$0xff] }
   0x9   :  { %v192_v27 = vld [vmem:[#allocation2] ss:$0 sm:$0xff] }
   0xb   :  { %110 = vmatpush.bf16.msra.mxu1 %v186_v8 }
   0xf   :  { %111 = vmatpush.bf16.msra.mxu1 %v185_v9 }
  0x76   :  { %v73_v13 = vpop.permute.xlu0 %72 }
  0x82   :  { %v60_v11 = vpop.f32.mrf.mxu0 }
  0x83   :  { %v61_v12 = vadd.f32 %v190_v10, %v60_v11 }
  0x85   :  { %v64_v14 = vmax.f32 %v61_v12, 0.0 }
  0x87   :  { %v76_v15 = vsel %vm75_vm2, %v64_v14, %v73_v13 }
  0x88   :  { %v77_v16 = vpack.c.bf16 %v76_v15, %v76_v15 }
  0x8a   :  { %v62_v17 = vpop.f32.mrf.mxu0  ;;  %174 = vmatmul.msk.bf16.vlgmr.msra.gmra.mxu1 %vm96_vm3, %v77_v16 }
 0x107   :  { %v113_v22 = vpop.f32.mrf.mxu1 }
 0x108   :  { %v114_v23 = vadd.f32 %v191_v21, %v113_v22 }
 0x10a   :  { %v117_v24 = vmax.f32 %v114_v23, 0.0 }
 0x10c   :  { %v123_v25 = vpack.c.bf16 %v117_v24, %v117_v24 }
 0x10e   :  { %183 = vmatmul.msk.bf16.vlgmr.msra.gmra.mxu2 %vm75_vm2, %v123_v25 }
 0x10f   :  { %v115_v26 = vpop.f32.mrf.mxu1 }
 0x191   :  { %v151_v28 = vpop.f32.mrf.mxu2 }
 0x192   :  { %v152_v29 = vadd.f32 %v192_v27, %v151_v28 }
 0x194   :  { %156 = vst.msk [vmem:[%s285_s8] sm:$0x3] %vm155_vm4, %v152_v29 }
 0x199   :  { %v153_v30 = vpop.f32.mrf.mxu2 }

</bundles_post_ra>
